<compile_context>
chip_gen: v6e
topology: v6e:2x2x1
jax: 0.10.0
libtpu: 0.0.40
codegen_flags: <defaults>
</compile_context>

<pallas_src>
import numpy as np
import jax
import jax.numpy as jnp
from jax.experimental import pallas as pl
from jax.experimental.pallas import tpu as pltpu


# ----------------------------------------------------------------------------
# librosa-compatible mel filterbank (Slaney scale + Slaney norm), numpy-only.
# ----------------------------------------------------------------------------
def _hz_to_mel(f):
    f = np.asarray(f, dtype=np.float64)
    f_sp = 200.0 / 3.0
    mels = f / f_sp
    min_log_hz = 1000.0
    min_log_mel = min_log_hz / f_sp
    logstep = np.log(6.4) / 27.0
    log_t = f >= min_log_hz
    mels = np.where(
        log_t, min_log_mel + np.log(np.maximum(f, 1e-10) / min_log_hz) / logstep, mels
    )
    return mels


def _mel_to_hz(m):
    m = np.asarray(m, dtype=np.float64)
    f_sp = 200.0 / 3.0
    freqs = f_sp * m
    min_log_hz = 1000.0
    min_log_mel = min_log_hz / f_sp
    logstep = np.log(6.4) / 27.0
    log_t = m >= min_log_mel
    freqs = np.where(log_t, min_log_hz * np.exp(logstep * (m - min_log_mel)), freqs)
    return freqs


def librosa_mel_fn(sr, n_fft, n_mels, fmin, fmax):
    if fmax is None:
        fmax = sr / 2.0
    n_freq = n_fft // 2 + 1
    fftfreqs = np.linspace(0.0, sr / 2.0, n_freq)
    mel_min, mel_max = _hz_to_mel(fmin), _hz_to_mel(fmax)
    mel_pts = np.linspace(mel_min, mel_max, n_mels + 2)
    hz_pts = _mel_to_hz(mel_pts)
    fdiff = np.diff(hz_pts)
    ramps = hz_pts[:, None] - fftfreqs[None, :]
    weights = np.zeros((n_mels, n_freq), dtype=np.float64)
    for i in range(n_mels):
        lower = -ramps[i] / fdiff[i]
        upper = ramps[i + 2] / fdiff[i + 1]
        weights[i] = np.maximum(0.0, np.minimum(lower, upper))
    enorm = 2.0 / (hz_pts[2 : n_mels + 2] - hz_pts[:n_mels])
    weights *= enorm[:, None]
    return weights.astype(np.float32)


# ----------------------------------------------------------------------------
# Pallas kernel: frames -> fused DFT matmul -> power -> stacked-mel matmul -> log10
# ----------------------------------------------------------------------------
def _mel_kernel(frames_ref, dft_ref, mel2_ref, out_ref):
    # frames: [TM, n_fft], dft: [n_fft, 2F] (= [cos | -sin]), mel2: [2F, n_mel_pad]
    spec = jnp.dot(frames_ref[...], dft_ref[...],
                   preferred_element_type=jnp.float32)          # [TM, 2F] = [re | im]
    power = spec * spec                                          # re^2 and im^2 lanes
    mel = jnp.dot(power, mel2_ref[...],
                  preferred_element_type=jnp.float32)            # [TM, n_mel_pad]
    out_ref[...] = jnp.log10(jnp.maximum(mel, 1e-5))


class Audio2Mel:
    def __init__(self, n_fft=1024, hop_length=256, win_length=1024,
                 sampling_rate=22050, n_mel_channels=80, mel_fmin=0.0,
                 mel_fmax=None, compute_dtype=jnp.float32):
        assert win_length == n_fft, "kernel assumes win_length == n_fft (as in defaults)"
        self.n_fft = n_fft
        self.hop_length = hop_length
        self.win_length = win_length
        self.sampling_rate = sampling_rate
        self.n_mel_channels = n_mel_channels
        self.compute_dtype = compute_dtype

        # torch.hann_window (periodic=True)
        n = np.arange(win_length, dtype=np.float64)
        window = 0.5 * (1.0 - np.cos(2.0 * np.pi * n / win_length))

        mel_basis = librosa_mel_fn(sampling_rate, n_fft, n_mel_channels,
                                   mel_fmin, mel_fmax)            # [n_mel, n_freq]
        n_freq = n_fft // 2 + 1

        # Drop the Nyquist bin only when it carries zero mel weight (exact no-op).
        if np.allclose(mel_basis[:, -1], 0.0):
            F = n_freq - 1                                        # 512 for n_fft=1024
        else:
            F = n_freq
        self.n_freq_k = F

        # Fused windowed real-DFT weights: [n_fft, 2F] = [w*cos | -w*sin]
        k = np.arange(F, dtype=np.float64)
        ang = 2.0 * np.pi * np.outer(n, k) / n_fft                # [n_fft, F]
        cos_m = window[:, None] * np.cos(ang)
        sin_m = window[:, None] * (-np.sin(ang))
        fused = np.concatenate([cos_m, sin_m], axis=1)            # [n_fft, 2F]
        self.fused_dft = jnp.asarray(fused.astype(np.float32)).astype(compute_dtype)

        # Stacked mel matrix so (spec*spec) @ mel2 == (re^2+im^2) @ mel^T,
        # with n_mel padded up to a multiple of 128 for lane-dense output stores.
        n_mel_pad = ((n_mel_channels + 127) // 128) * 128
        self.n_mel_pad = n_mel_pad
        mel_t = mel_basis[:, :F].T                                # [F, n_mel]
        mel2 = np.concatenate([mel_t, mel_t], axis=0)             # [2F, n_mel]
        mel2 = np.pad(mel2, ((0, 0), (0, n_mel_pad - n_mel_channels)))
        self.mel2 = jnp.asarray(mel2.astype(np.float32))          # keep f32 (small matmul)

    def __call__(self, audioin):
        shape = audioin.shape
        if len(shape) > 2:
            audioin = audioin.reshape(shape[0] * shape[1], -1)
        B, L = audioin.shape

        # glue: reflect pad + strided framing in plain JAX
        p = (self.n_fft - self.hop_length) // 2
        audio = jnp.pad(audioin.astype(jnp.float32), ((0, 0), (p, p)), mode="reflect")
        Lp = L + 2 * p
        T = 1 + (Lp - self.n_fft) // self.hop_length
        idx = (np.arange(T)[:, None] * self.hop_length
               + np.arange(self.n_fft)[None, :])                  # [T, n_fft]
        frames = jnp.take(audio, jnp.asarray(idx), axis=1)        # [B, T, n_fft]
        frames = frames.reshape(B * T, self.n_fft).astype(self.compute_dtype)

        rows = B * T
        TM = min(512, ((rows + 7) // 8) * 8)                      # big row tile, 8-aligned
        pad_rows = (-rows) % TM
        if pad_rows:
            frames = jnp.pad(frames, ((0, pad_rows), (0, 0)))
        rows_p = rows + pad_rows

        F2 = 2 * self.n_freq_k
        n_mel_pad = self.n_mel_pad

        cost = pl.CostEstimate(
            flops=int(rows_p * (2 * self.n_fft * F2 + F2 + 2 * F2 * n_mel_pad)),
            transcendentals=int(rows_p * n_mel_pad),
            bytes_accessed=int(rows_p * self.n_fft * frames.dtype.itemsize
                               + self.fused_dft.size * self.fused_dft.dtype.itemsize
                               + self.mel2.size * 4
                               + rows_p * n_mel_pad * 4),
        )

        out = pl.pallas_call(
            _mel_kernel,
            out_shape=jax.ShapeDtypeStruct((rows_p, n_mel_pad), jnp.float32),
            grid=(rows_p // TM,),
            in_specs=[
                pl.BlockSpec((TM, self.n_fft), lambda i: (i, 0)),
                pl.BlockSpec((self.n_fft, F2), lambda i: (0, 0)),
                pl.BlockSpec((F2, n_mel_pad), lambda i: (0, 0)),
            ],
            out_specs=pl.BlockSpec((TM, n_mel_pad), lambda i: (i, 0)),
            compiler_params=pltpu.CompilerParams(
                dimension_semantics=("parallel",),
                vmem_limit_bytes=32 * 1024 * 1024),
            cost_estimate=cost,
        )(frames, self.fused_dft, self.mel2)

        out = out[:rows, :self.n_mel_channels]                    # drop pad rows / lanes
        log_mel = out.reshape(B, T, self.n_mel_channels)
        log_mel = jnp.transpose(log_mel, (0, 2, 1))               # [B, n_mel, T] (torch layout)
        if len(shape) > 2:
            log_mel = log_mel.reshape(shape[0], shape[1], -1)
        return log_mel


def _reference_log_mel(a2m, audioin):
    """Pure-JAX reference using jnp.fft.rfft (independent of the kernel's DFT matrices)."""
    shape = audioin.shape
    x = audioin.reshape(shape[0] * shape[1], -1) if len(shape) > 2 else audioin
    p = (a2m.n_fft - a2m.hop_length) // 2
    audio = jnp.pad(x.astype(jnp.float32), ((0, 0), (p, p)), mode="reflect")
    T = 1 + (audio.shape[1] - a2m.n_fft) // a2m.hop_length
    idx = np.arange(T)[:, None] * a2m.hop_length + np.arange(a2m.n_fft)[None, :]
    frames = jnp.take(audio, jnp.asarray(idx), axis=1)            # [B, T, n_fft]
    n = np.arange(a2m.n_fft, dtype=np.float64)
    window = jnp.asarray((0.5 * (1.0 - np.cos(2.0 * np.pi * n / a2m.n_fft))).astype(np.float32))
    spec = jnp.fft.rfft(frames * window, axis=-1)                 # [B, T, n_freq]
    power = jnp.real(spec) ** 2 + jnp.imag(spec) ** 2
    mel_basis = jnp.asarray(librosa_mel_fn(a2m.sampling_rate, a2m.n_fft,
                                           a2m.n_mel_channels, 0.0, None))
    mel = jnp.einsum("mf,btf->bmt", mel_basis, power)
    log_mel = jnp.log10(jnp.maximum(mel, 1e-5))
    if len(shape) > 2:
        log_mel = log_mel.reshape(shape[0], shape[1], -1)
    return log_mel


if __name__ == "__main__":
    # Small, module-consistent configuration (scaled-down n_fft/hop/n_mels).
    n_fft, hop, n_mel = 128, 32, 16
    a2m = Audio2Mel(n_fft=n_fft, hop_length=hop, win_length=n_fft,
                    sampling_rate=22050, n_mel_channels=n_mel,
                    mel_fmin=0.0, mel_fmax=None)

    key = jax.random.PRNGKey(0)
    # 3-D input exercises the reshape path: [B0, B1, samples]
    audio = jax.random.normal(key, (2, 1, 1024), dtype=jnp.float32)

    log_mel = a2m(audio)
    jax.block_until_ready(log_mel)

    # expected output shape: (2, 1, n_mel * n_frames) = (2, 1, 16 * 32)
    assert log_mel.shape == (2, 1, n_mel * 32), log_mel.shape

    # numerical check against an independent rfft-based reference
    ref = _reference_log_mel(a2m, audio)
    jax.block_until_ready(ref)
    max_err = float(jnp.max(jnp.abs(log_mel - ref)))
    assert max_err < 5e-3, f"max abs error vs reference: {max_err}"

    print("KERNEL_OK")
</pallas_src>

<mosaic_0001>
module attributes {stable_mosaic.version = 11 : i64} {
  func.func @_mel_kernel(%arg0: i32, %arg1: memref<64x128xf32, #tpu.memory_space<vmem>>, %arg2: memref<128x128xf32, #tpu.memory_space<vmem>>, %arg3: memref<128x128xf32, #tpu.memory_space<vmem>>, %arg4: memref<64x128xf32, #tpu.memory_space<vmem>>) attributes {dimension_semantics = [#tpu.dimension_semantics<parallel>], iteration_bounds = array<i64: 1>, scalar_prefetch = 0 : i64, scratch_operands = 0 : i64, tpu.core_type = #tpu.core_type<tc>, window_params = [{transform_indices = @transform_0, window_bounds = array<i64: 64, 128>}, {pipeline_mode = #tpu.pipeline_mode<synchronous>, transform_indices = @transform_1, window_bounds = array<i64: 128, 128>}, {pipeline_mode = #tpu.pipeline_mode<synchronous>, transform_indices = @transform_2, window_bounds = array<i64: 128, 128>}, {transform_indices = @transform_3, window_bounds = array<i64: 64, 128>}]} {
    %c0 = arith.constant 0 : index
    %c0_0 = arith.constant 0 : index
    %0 = vector.load %arg1[%c0, %c0_0] : memref<64x128xf32, #tpu.memory_space<vmem>>, vector<64x128xf32>
    %c0_1 = arith.constant 0 : index
    %c0_2 = arith.constant 0 : index
    %1 = vector.load %arg2[%c0_1, %c0_2] : memref<128x128xf32, #tpu.memory_space<vmem>>, vector<128x128xf32>
    %cst = arith.constant dense<0.000000e+00> : vector<64x128xf32>
    %2 = tpu.matmul %0, %1, %cst {dimension_numbers = #tpu.dot_dimension_numbers<[1], [0], [0], [1], [0, 0, 1, 1], [], []>} : vector<64x128xf32>, vector<128x128xf32>, vector<64x128xf32> -> vector<64x128xf32>
    %3 = arith.mulf %2, %2 : vector<64x128xf32>
    %c0_3 = arith.constant 0 : index
    %c0_4 = arith.constant 0 : index
    %4 = vector.load %arg3[%c0_3, %c0_4] : memref<128x128xf32, #tpu.memory_space<vmem>>, vector<128x128xf32>
    %cst_5 = arith.constant dense<0.000000e+00> : vector<64x128xf32>
    %5 = tpu.matmul %3, %4, %cst_5 {dimension_numbers = #tpu.dot_dimension_numbers<[1], [0], [0], [1], [0, 0, 1, 1], [], []>} : vector<64x128xf32>, vector<128x128xf32>, vector<64x128xf32> -> vector<64x128xf32>
    %cst_6 = arith.constant 9.99999974E-6 : f32
    %6 = vector.broadcast %cst_6 : f32 to vector<64x128xf32>
    %7 = arith.maximumf %5, %6 : vector<64x128xf32>
    %8 = math.log %7 : vector<64x128xf32>
    %cst_7 = arith.constant 0.434294492 : f32
    %9 = vector.broadcast %cst_7 : f32 to vector<64x128xf32>
    %10 = arith.mulf %8, %9 : vector<64x128xf32>
    %c0_8 = arith.constant 0 : index
    %c0_9 = arith.constant 0 : index
    %11 = vector.load %arg4[%c0_8, %c0_9] : memref<64x128xf32, #tpu.memory_space<vmem>>, vector<64x128xf32>
    tpu.vector_store %arg4[%c0_8, %c0_9], %10 {strides = array<i32>} : memref<64x128xf32, #tpu.memory_space<vmem>>, vector<64x128xf32>,
    return
  }
  func.func @transform_0(%arg0: i32) -> (i32, i32) {
    %c0_i32 = arith.constant 0 : i32
    %c0_i32_0 = arith.constant 0 : i32
    return %arg0, %c0_i32 : i32, i32
  }
  func.func @transform_1(%arg0: i32) -> (i32, i32) {
    %c0_i32 = arith.constant 0 : i32
    %c0_i32_0 = arith.constant 0 : i32
    %c0_i32_1 = arith.constant 0 : i32
    return %c0_i32, %c0_i32_0 : i32, i32
  }
  func.func @transform_2(%arg0: i32) -> (i32, i32) {
    %c0_i32 = arith.constant 0 : i32
    %c0_i32_0 = arith.constant 0 : i32
    %c0_i32_1 = arith.constant 0 : i32
    return %c0_i32, %c0_i32_0 : i32, i32
  }
  func.func @transform_3(%arg0: i32) -> (i32, i32) {
    %c0_i32 = arith.constant 0 : i32
    %c0_i32_0 = arith.constant 0 : i32
    return %arg0, %c0_i32 : i32, i32
  }
}

</mosaic_0001>

<bundles_post_ra>
// kernel: tpu_custom_call.1
= control target key start
LH: loop header
LB: loop body
LE: loop exit
PB: predicated region body
PF: predicated region fallthrough
CT: control target
= control target key end

     0   :  { %8 = vsyncpa [#allocation3], 0  ;;  %s666_s0 = inlined_call_operand.hbm [shape: f32[64,128], index: 0, kind: input, shape index: {}]   ;;  %s667_s1 = inlined_call_operand.hbm [shape: f32[128,128], index: 1, kind: input, shape index: {}]   ;;  %s668_s2 = inlined_call_operand.hbm [shape: f32[128,128], index: 2, kind: input, shape index: {}]   ;;  %s669_s3 = inlined_call_operand.hbm [shape: f32[64,128], index: 3, kind: output, shape index: {}]  }
   0x1   :  { %9 = vsyncpa [#allocation6], 0 }
   0x2   :  { %10 = vsyncpa [#allocation4], 0  ;;  %s616_s12 = smov [#allocation5]   ;;  %s617_s14 = smov [#allocation2]  }
   0x3   :  { %s28_s13 = sshll.u32 %s616_s12, 4  ;;  %s16_s15 = sshll.u32 %s617_s14, 4  ;;  %s29_s13 = int_to_ptr.vmem [resolvable:$true] %s28_s13  ;;  %s17_s15 = int_to_ptr.vmem [resolvable:$true] %s16_s15 }
   0x4   :  { %s538_s16 = scalar_lea.vmem %s29_s13, 2048  ;;  %p543_p1 = scmp.lt.s32.totalorder %s29_s13, %s29_s13 }
   0x5   :  { %p539_p0 = scmp.ne.s32.totalorder %s29_s13, %s538_s16  ;;  %p544_p2 = scmp.lt.s32.totalorder %s538_s16, %s538_s16 }
   0x7   :  { %p545_p3 = por %p544_p2, %p543_p1 }
   0x9   :  { %p546_p4 = pnand %p545_p3, %p539_p0 }
   0xb   :  { %549 = shalt.err (!%p546_p4)
}
   0xc   :  { %s618_s17 = smov 128   ;;  %s619_s18 = smov 8  }
   0xd   :  { %34 = dma.hbm_to_vmem [thread:$0]  %s667_s1, 2048, %s29_s13, [#allocation6], %s618_s17, %s618_s17, %s619_s18  }
   0xe   :  { %s558_s21 = scalar_lea.vmem %s17_s15, 1024  ;;  %p563_p6 = scmp.lt.s32.totalorder %s17_s15, %s17_s15 }
   0xf   :  { %p559_p5 = scmp.ne.s32.totalorder %s17_s15, %s558_s21  ;;  %p564_p7 = scmp.lt.s32.totalorder %s558_s21, %s558_s21 }
  0x11   :  { %p565_p8 = por %p564_p7, %p563_p6 }
  0x13   :  { %p566_p9 = pnand %p565_p8, %p559_p5 }
  0x15   :  { %569 = shalt.err (!%p566_p9)
}
  0x16   :  { %22 = dma.hbm_to_vmem [thread:$0]  %s666_s0, 1024, %s17_s15, [#allocation3], %s618_s17, %s618_s17, %s619_s18  }
  0x17   :  { %s620_s24 = smov [#allocation7]  }
  0x18   :  { %s40_s25 = sshll.u32 %s620_s24, 4  ;;  %s41_s25 = int_to_ptr.vmem [resolvable:$true] %s40_s25 }
  0x19   :  { %s578_s26 = scalar_lea.vmem %s41_s25, 2048  ;;  %p583_p11 = scmp.lt.s32.totalorder %s41_s25, %s41_s25 }
  0x1a   :  { %p579_p10 = scmp.ne.s32.totalorder %s41_s25, %s578_s26  ;;  %p584_p12 = scmp.lt.s32.totalorder %s578_s26, %s578_s26 }
  0x1c   :  { %p585_p13 = por %p584_p12, %p583_p11 }
  0x1e   :  { %p586_p0 = pnand %p585_p13, %p579_p10 }
  0x20   :  { %589 = shalt.err (!%p586_p0)
}
  0x21   :  { %46 = dma.hbm_to_vmem [thread:$0]  %s668_s2, 2048, %s41_s25, [#allocation6], %s618_s17, %s618_s17, %s619_s18  }
  0x22   :  { %610 = dma.done.wait [#allocation3], 1024  }
  0x23   :  { %611 = vsyncadd [#allocation3], 4294966272 }
  0x24   :  { %612 = dma.done.wait [#allocation6], 4096  }
  0x25   :  { %613 = vsyncadd [#allocation6], 4294963200  ;;  %v79_v0 = vld [vmem:[#allocation5 + $0x78] sm:$0xff]  ;;  %v78_v1 = vld [vmem:[#allocation5 + $0x70] sm:$0xff]  ;;  %s621_s0 = smov [#allocation8]  }
  0x26   :  { %420 = vmatprep.subr.mxu0 %v79_v0  ;;  %v77_v2 = vld [vmem:[#allocation5 + $0x68] sm:$0xff]  ;;  %v76_v3 = vld [vmem:[#allocation5 + $0x60] sm:$0xff]  ;;  %v75_v5 = vld [vmem:[#allocation5 + $0x58] sm:$0xff]  ;;  %s359_s2 = sshll.u32 %s621_s0, 4  ;;  %s360_s2 = int_to_ptr.vmem [resolvable:$true] %s359_s2 }
  0x27   :  { %421 = vmatpush3.msra.mxu0 %v79_v0  ;;  %v56_v4 = vld [vmem:[#allocation2] sm:$0xff]  ;;  %v74_v6 = vld [vmem:[#allocation5 + $0x50] sm:$0xff]  ;;  %v208_v7 = vld [vmem:[#allocation7 + $0x78] sm:$0xff]  ;;  %s590_s28 = scalar_lea.vmem %s360_s2, 1024  ;;  %p595_p2 = scmp.lt.s32.totalorder %s360_s2, %s360_s2 }
  0x28   :  { %422 = vmatprep.subr.mxu0 %v78_v1  ;;  %452 = vmatprep.mubr.f32.mxu0 %v56_v4  ;;  %v207_v8 = vld [vmem:[#allocation7 + $0x70] sm:$0xff]  ;;  %v73_v9 = vld [vmem:[#allocation5 + $0x48] sm:$0xff]  ;;  %v72_v11 = vld [vmem:[#allocation5 + $0x40] sm:$0xff]  ;;  %p591_p1 = scmp.ne.s32.totalorder %s360_s2, %s590_s28  ;;  %p596_p3 = scmp.lt.s32.totalorder %s590_s28, %s590_s28 }
  0x29   :  { %423 = vmatpush3.msra.mxu0 %v78_v1  ;;  %464 = vmatprep.subr.mxu1 %v208_v7  ;;  %v206_v10 = vld [vmem:[#allocation7 + $0x68] sm:$0xff]  ;;  %v205_v12 = vld [vmem:[#allocation7 + $0x60] sm:$0xff]  ;;  %v71_v13 = vld [vmem:[#allocation5 + $0x38] sm:$0xff] }
  0x2a   :  { %424 = vmatprep.subr.mxu0 %v77_v2  ;;  %465 = vmatpush3.msra.mxu1 %v208_v7  ;;  %v204_v14 = vld [vmem:[#allocation7 + $0x58] sm:$0xff]  ;;  %v70_v15 = vld [vmem:[#allocation5 + $0x30] sm:$0xff]  ;;  %v69_v17 = vld [vmem:[#allocation5 + $0x28] sm:$0xff]  ;;  %p597_p4 = por %p596_p3, %p595_p2 }
  0x2b   :  { %425 = vmatpush3.msra.mxu0 %v77_v2  ;;  %466 = vmatprep.subr.mxu1 %v207_v8  ;;  %v203_v16 = vld [vmem:[#allocation7 + $0x50] sm:$0xff]  ;;  %v202_v18 = vld [vmem:[#allocation7 + $0x48] sm:$0xff]  ;;  %v68_v19 = vld [vmem:[#allocation5 + $0x20] sm:$0xff] }
  0x2c   :  { %426 = vmatprep.subr.mxu0 %v76_v3  ;;  %467 = vmatpush3.msra.mxu1 %v207_v8  ;;  %v201_v20 = vld [vmem:[#allocation7 + $0x40] sm:$0xff]  ;;  %v67_v21 = vld [vmem:[#allocation5 + $0x18] sm:$0xff]  ;;  %v66_v23 = vld [vmem:[#allocation5 + $0x10] sm:$0xff]  ;;  %p598_p5 = pnand %p597_p4, %p591_p1 }
  0x2d   :  { %427 = vmatpush3.msra.mxu0 %v76_v3  ;;  %468 = vmatprep.subr.mxu1 %v206_v10  ;;  %v200_v22 = vld [vmem:[#allocation7 + $0x38] sm:$0xff]  ;;  %v199_v24 = vld [vmem:[#allocation7 + $0x30] sm:$0xff]  ;;  %v65_v25 = vld [vmem:[#allocation5 + $0x8] sm:$0xff] }
  0x2e   :  { %428 = vmatprep.subr.mxu0 %v75_v5  ;;  %469 = vmatpush3.msra.mxu1 %v206_v10  ;;  %v198_v26 = vld [vmem:[#allocation7 + $0x28] sm:$0xff]  ;;  %v64_v27 = vld [vmem:[#allocation5] sm:$0xff]  ;;  %v196_v30 = vld [vmem:[#allocation7 + $0x18] sm:$0xff] }
  0x2f   :  { %429 = vmatpush3.msra.mxu0 %v75_v5  ;;  %470 = vmatprep.subr.mxu1 %v205_v12  ;;  %v197_v28 = vld [vmem:[#allocation7 + $0x20] sm:$0xff]  ;;  %v57_v29 = vld [vmem:[#allocation2 + $0x8] sm:$0xff]  ;;  %v58_v31 = vld [vmem:[#allocation2 + $0x10] sm:$0xff] }
  0x30   :  { %430 = vmatprep.subr.mxu0 %v74_v6  ;;  %471 = vmatpush3.msra.mxu1 %v205_v12  ;;  %v59_v32 = vld [vmem:[#allocation2 + $0x18] sm:$0xff]  ;;  %v60_v33 = vld [vmem:[#allocation2 + $0x20] sm:$0xff]  ;;  %v61_v34 = vld [vmem:[#allocation2 + $0x28] sm:$0xff] }
  0x31   :  { %431 = vmatpush3.msra.mxu0 %v74_v6  ;;  %472 = vmatprep.subr.mxu1 %v204_v14  ;;  %v62_v35 = vld [vmem:[#allocation2 + $0x30] sm:$0xff]  ;;  %v63_v36 = vld [vmem:[#allocation2 + $0x38] sm:$0xff]  ;;  %v194_v38 = vld [vmem:[#allocation7 + $0x8] sm:$0xff] }
  0x32   :  { %432 = vmatprep.subr.mxu0 %v73_v9  ;;  %473 = vmatpush3.msra.mxu1 %v204_v14  ;;  %v195_v37 = vld [vmem:[#allocation7 + $0x10] sm:$0xff]  ;;  %v193_v39 = vld [vmem:[#allocation7] sm:$0xff] }
  0x33   :  { %433 = vmatpush3.msra.mxu0 %v73_v9  ;;  %474 = vmatprep.subr.mxu1 %v203_v16 }
  0x34   :  { %434 = vmatprep.subr.mxu0 %v72_v11  ;;  %475 = vmatpush3.msra.mxu1 %v203_v16 }
  0x35   :  { %435 = vmatpush3.msra.mxu0 %v72_v11  ;;  %476 = vmatprep.subr.mxu1 %v202_v18 }
  0x36   :  { %436 = vmatprep.subr.mxu0 %v71_v13  ;;  %477 = vmatpush3.msra.mxu1 %v202_v18 }
  0x37   :  { %437 = vmatpush3.msra.mxu0 %v71_v13  ;;  %478 = vmatprep.subr.mxu1 %v201_v20 }
  0x38   :  { %438 = vmatprep.subr.mxu0 %v70_v15  ;;  %479 = vmatpush3.msra.mxu1 %v201_v20 }
  0x39   :  { %439 = vmatpush3.msra.mxu0 %v70_v15  ;;  %480 = vmatprep.subr.mxu1 %v200_v22 }
  0x3a   :  { %440 = vmatprep.subr.mxu0 %v69_v17  ;;  %481 = vmatpush3.msra.mxu1 %v200_v22 }
  0x3b   :  { %441 = vmatpush3.msra.mxu0 %v69_v17  ;;  %482 = vmatprep.subr.mxu1 %v199_v24 }
  0x3c   :  { %442 = vmatprep.subr.mxu0 %v68_v19  ;;  %483 = vmatpush3.msra.mxu1 %v199_v24 }
  0x3d   :  { %443 = vmatpush3.msra.mxu0 %v68_v19  ;;  %484 = vmatprep.subr.mxu1 %v198_v26 }
  0x3e   :  { %444 = vmatprep.subr.mxu0 %v67_v21  ;;  %485 = vmatpush3.msra.mxu1 %v198_v26 }
  0x3f   :  { %445 = vmatpush3.msra.mxu0 %v67_v21  ;;  %486 = vmatprep.subr.mxu1 %v197_v28 }
  0x40   :  { %446 = vmatprep.subr.mxu0 %v66_v23  ;;  %487 = vmatpush3.msra.mxu1 %v197_v28 }
  0x41   :  { %447 = vmatpush3.msra.mxu0 %v66_v23  ;;  %488 = vmatprep.subr.mxu1 %v196_v30 }
  0x42   :  { %448 = vmatprep.subr.mxu0 %v65_v25  ;;  %489 = vmatpush3.msra.mxu1 %v196_v30 }
  0x43   :  { %449 = vmatpush3.msra.mxu0 %v65_v25  ;;  %490 = vmatprep.subr.mxu1 %v195_v37 }
  0x44   :  { %450 = vmatprep.subr.mxu0 %v64_v27  ;;  %491 = vmatpush3.msra.mxu1 %v195_v37 }
  0x45   :  { %451 = vmatpush3.msra.mxu0 %v64_v27  ;;  %492 = vmatprep.subr.mxu1 %v194_v38 }
  0x46   :  { %453 = vmatmul.mubr.f32.vlgmr.msra.gmra.mxu0 %v57_v29  ;;  %493 = vmatpush3.msra.mxu1 %v194_v38 }
  0x47   :  { %455 = vmatprep.mubr.f32.mxu0 %v58_v31  ;;  %494 = vmatprep.subr.mxu1 %v193_v39 }
  0x48   :  { %495 = vmatpush3.msra.mxu1 %v193_v39 }
  0x4a   :  { %456 = vmatmul.mubr.f32.gmra.mxu0 %v59_v32 }
  0x4b   :  { %458 = vmatprep.mubr.f32.mxu0 %v60_v33 }
  0x4e   :  { %459 = vmatmul.mubr.f32.gmra.mxu0 %v61_v34 }
  0x4f   :  { %461 = vmatprep.mubr.f32.mxu0 %v62_v35 }
  0x52   :  { %462 = vmatmul.mubr.f32.gmra.mxu0 %v63_v36 }
 0x106   :  { %v454_v40 = vpop.f32.mrf.mxu0 }
 0x107   :  { %v186_v43 = vmul.f32 %v454_v40, %v454_v40 }
 0x108   :  { %v146_v41 = vpop.f32.mrf.mxu0 }
 0x109   :  { %v185_v42 = vmul.f32 %v146_v41, %v146_v41 }
 0x10a   :  { %v457_v44 = vpop.f32.mrf.mxu0 }
 0x10b   :  { %496 = vmatprep.mubr.f32.mxu1 %v185_v42  ;;  %v188_v47 = vmul.f32 %v457_v44, %v457_v44 }
 0x10c   :  { %v156_v45 = vpop.f32.mrf.mxu0  ;;  %497 = vmatmul.mubr.f32.vlgmr.msra.gmra.mxu1 %v186_v43 }
 0x10d   :  { %v187_v46 = vmul.f32 %v156_v45, %v156_v45 }
 0x10e   :  { %v460_v48 = vpop.f32.mrf.mxu0 }
 0x10f   :  { %499 = vmatprep.mubr.f32.mxu1 %v187_v46  ;;  %v190_v51 = vmul.f32 %v460_v48, %v460_v48 }
 0x110   :  { %v166_v49 = vpop.f32.mrf.mxu0  ;;  %500 = vmatmul.mubr.f32.gmra.mxu1 %v188_v47 }
 0x111   :  { %v189_v50 = vmul.f32 %v166_v49, %v166_v49 }
 0x112   :  { %v463_v52 = vpop.f32.mrf.mxu0 }
 0x113   :  { %502 = vmatprep.mubr.f32.mxu1 %v189_v50  ;;  %v192_v55 = vmul.f32 %v463_v52, %v463_v52 }
 0x114   :  { %v176_v53 = vpop.f32.mrf.mxu0  ;;  %503 = vmatmul.mubr.f32.gmra.mxu1 %v190_v51 }
 0x115   :  { %v191_v54 = vmul.f32 %v176_v53, %v176_v53 }
 0x117   :  { %505 = vmatprep.mubr.f32.mxu1 %v191_v54 }
 0x118   :  { %506 = vmatmul.mubr.f32.gmra.mxu1 %v192_v55 }
 0x1cc   :  { %v498_v56 = vpop.f32.mrf.mxu1 }
 0x1cd   :  { %v315_v57 = vmax.f32 %v498_v56, 1e-05 }
 0x1ce   :  { %v275_v58 = vpop.f32.mrf.mxu1 }
 0x1cf   :  { %514 = vlog2.f32 %v315_v57  ;;  %v314_v59 = vmax.f32 %v275_v58, 1e-05 }
 0x1d0   :  { %v501_v60 = vpop.f32.mrf.mxu1 }
 0x1d1   :  { %516 = vlog2.f32 %v314_v59  ;;  %v317_v61 = vmax.f32 %v501_v60, 1e-05 }
 0x1d2   :  { %v285_v62 = vpop.f32.mrf.mxu1 }
 0x1d3   :  { %518 = vlog2.f32 %v317_v61  ;;  %v316_v63 = vmax.f32 %v285_v62, 1e-05 }
 0x1d4   :  { %v504_v0 = vpop.f32.mrf.mxu1 }
 0x1d5   :  { %520 = vlog2.f32 %v316_v63  ;;  %v319_v1 = vmax.f32 %v504_v0, 1e-05 }
 0x1d6   :  { %v295_v2 = vpop.f32.mrf.mxu1 }
 0x1d7   :  { %522 = vlog2.f32 %v319_v1  ;;  %v318_v3 = vmax.f32 %v295_v2, 1e-05 }
 0x1d8   :  { %v507_v4 = vpop.f32.mrf.mxu1 }
 0x1d9   :  { %524 = vlog2.f32 %v318_v3  ;;  %v321_v5 = vmax.f32 %v507_v4, 1e-05 }
 0x1da   :  { %v305_v6 = vpop.f32.mrf.mxu1 }
 0x1db   :  { %526 = vlog2.f32 %v321_v5  ;;  %v320_v7 = vmax.f32 %v305_v6, 1e-05 }
 0x1dc   :  { %v515_v8 = vpop.eup %514 }
 0x1dd   :  { %v325_v9 = vmul.f32 0.6931472, %v515_v8  ;;  %528 = vlog2.f32 %v320_v7 }
 0x1de   :  { %v517_v10 = vpop.eup %516 }
 0x1df   :  { %v339_v11 = vmul.f32 0.4342945, %v325_v9  ;;  %v323_v12 = vmul.f32 0.6931472, %v517_v10 }
 0x1e0   :  { %v519_v13 = vpop.eup %518 }
 0x1e1   :  { %347 = vst [vmem:[#allocation8 + $0x8] sm:$0xff] %v339_v11  ;;  %v338_v14 = vmul.f32 0.4342945, %v323_v12  ;;  %v329_v15 = vmul.f32 0.6931472, %v519_v13 }
 0x1e2   :  { %v521_v16 = vpop.eup %520 }
 0x1e3   :  { %346 = vst [vmem:[#allocation8] sm:$0xff] %v338_v14  ;;  %v341_v17 = vmul.f32 0.4342945, %v329_v15  ;;  %v327_v18 = vmul.f32 0.6931472, %v521_v16 }
 0x1e4   :  { %v523_v19 = vpop.eup %522 }
 0x1e5   :  { %349 = vst [vmem:[#allocation8 + $0x18] sm:$0xff] %v341_v17  ;;  %v340_v20 = vmul.f32 0.4342945, %v327_v18  ;;  %v333_v21 = vmul.f32 0.6931472, %v523_v19 }
 0x1e6   :  { %v525_v22 = vpop.eup %524 }
 0x1e7   :  { %348 = vst [vmem:[#allocation8 + $0x10] sm:$0xff] %v340_v20  ;;  %v343_v23 = vmul.f32 0.4342945, %v333_v21  ;;  %v331_v24 = vmul.f32 0.6931472, %v525_v22 }
 0x1e8   :  { %v527_v25 = vpop.eup %526 }
 0x1e9   :  { %351 = vst [vmem:[#allocation8 + $0x28] sm:$0xff] %v343_v23  ;;  %v342_v26 = vmul.f32 0.4342945, %v331_v24  ;;  %v337_v27 = vmul.f32 0.6931472, %v527_v25 }
 0x1ea   :  { %v529_v28 = vpop.eup %528 }
 0x1eb   :  { %350 = vst [vmem:[#allocation8 + $0x20] sm:$0xff] %v342_v26  ;;  %v345_v29 = vmul.f32 0.4342945, %v337_v27  ;;  %v335_v30 = vmul.f32 0.6931472, %v529_v28 }
 0x1ed   :  { %353 = vst [vmem:[#allocation8 + $0x38] sm:$0xff] %v345_v29  ;;  %v344_v31 = vmul.f32 0.4342945, %v335_v30 }
 0x1ef   :  { %352 = vst [vmem:[#allocation8 + $0x30] sm:$0xff] %v344_v31 }
 0x1f0   :  { %601 = shalt.err (!%p598_p5)
}
 0x1f1   :  { %365 = dma.vmem_to_hbm [thread:$0]  %s360_s2, 1024, %s669_s3, [#allocation4], %s618_s17, %s618_s17, %s619_s18  }
 0x1f2   :  { %614 = dma.done.wait [#allocation4], 1024  }
 0x1f3   :  { %615 = vsyncadd [#allocation4], 4294966272 }
 0x1f4   :  { %369 = vsyncpa [#allocation3], 1 }
 0x1f5   :  { %370 = vsyncpa [#allocation6], 1 }
 0x1f6   :  { %371 = vsyncpa [#allocation4], 1 }

</bundles_post_ra>
